<compile_context>
chip_gen: v5e
topology: v5e:2x2
jax: 0.10.0
libtpu: 0.0.40
codegen_flags: <defaults>
</compile_context>

<pallas_src>
import jax
import jax.numpy as jnp
from jax.experimental import pallas as pl
from jax.experimental.pallas import tpu as pltpu


# ----------------------------------------------------------------- kernel

def _ta2_kernel(x_ref, cw1_ref, cw2_ref, m1_ref, m2_ref, o_ref):
    """Fused TA2 forward.

    x_ref  : [B, C, HW]   input, spatial flattened onto lanes
    cw1_ref: [C, HW]      depthwise conv #1 weight (kernel == full spatial)
    cw2_ref: [C, HW]      depthwise conv #2 weight
    m1_ref : [C, Cmid]    shared_MLP conv1 as block-diagonal dense matrix
    m2_ref : [Cmid, C]    shared_MLP conv2 as block-diagonal dense matrix
    o_ref  : [B, C, HW]   sigmoid(MLP(dw1(x)) + MLP(dw2(x))) * x
    """
    x = x_ref[...]

    # Full-spatial depthwise convs -> per-(batch, channel) scalars. One fused
    # multiply + one lane reduction per branch.
    w1 = jnp.sum(x * cw1_ref[...][None, :, :], axis=-1)        # [B, C]
    w2 = jnp.sum(x * cw2_ref[...][None, :, :], axis=-1)        # [B, C]

    # shared_MLP: grouped 1x1 convs as dense block-diagonal matmuls.
    m1 = m1_ref[...]
    m2 = m2_ref[...]
    h1 = jnp.maximum(jnp.dot(w1, m1, preferred_element_type=jnp.float32), 0.0)
    h2 = jnp.maximum(jnp.dot(w2, m1, preferred_element_type=jnp.float32), 0.0)
    y1 = jnp.dot(h1, m2, preferred_element_type=jnp.float32)
    y2 = jnp.dot(h2, m2, preferred_element_type=jnp.float32)

    weight = jax.nn.sigmoid(y1 + y2)                            # [B, C]

    # Channel attention applied to x; output last dim = HW (lane-dense store).
    o_ref[...] = weight[:, :, None] * x


# ----------------------------------------------------------------- wrapper

def ta2_forward(x_nchw, params):
    """TA2.forward. x_nchw: [B, C, H, W] with H == W == kernel_size (so the
    depthwise conv output is 1x1 and `weight * x` broadcasts like PyTorch)."""
    b, c, h, w = x_nchw.shape
    hw = h * w
    x = x_nchw.reshape(b, c, hw)
    out = pl.pallas_call(
        _ta2_kernel,
        out_shape=jax.ShapeDtypeStruct((b, c, hw), jnp.float32),
        in_specs=[pl.BlockSpec(memory_space=pltpu.MemorySpace.VMEM)] * 5,
        out_specs=pl.BlockSpec(memory_space=pltpu.MemorySpace.VMEM),
    )(x, params["cw1"], params["cw2"], params["m1"], params["m2"])
    return out.reshape(b, c, h, w)


# ----------------------------------------------------------------- parameters

def _block_diagonal(w, groups):
    """Pack a grouped 1x1 conv weight [Cout, Cin//groups] (PyTorch layout,
    1x1 spatial squeezed) into a dense block-diagonal [Cin, Cout] matrix so the
    grouped conv becomes a single matmul."""
    cout, cin_pg = w.shape
    cout_pg = cout // groups
    cin = cin_pg * groups
    m = jnp.zeros((cin, cout), jnp.float32)
    for g in range(groups):
        blk = w[g * cout_pg:(g + 1) * cout_pg, :]               # [cout_pg, cin_pg]
        m = m.at[g * cin_pg:(g + 1) * cin_pg,
                 g * cout_pg:(g + 1) * cout_pg].set(blk.T)
    return m


def init_ta2(key, in_channel, groups, ks, ratio=9):
    mid = in_channel // ratio * 3
    assert in_channel % groups == 0 and mid % groups == 0
    k = jax.random.split(key, 4)
    # Weights drawn in PyTorch layouts, then repacked for the kernel.
    cw1 = 0.1 * jax.random.normal(k[0], (in_channel, ks, ks), jnp.float32)
    cw2 = 0.1 * jax.random.normal(k[1], (in_channel, ks, ks), jnp.float32)
    mlp1 = 0.1 * jax.random.normal(k[2], (mid, in_channel // groups), jnp.float32)
    mlp2 = 0.1 * jax.random.normal(k[3], (in_channel, mid // groups), jnp.float32)
    return {
        "cw1": cw1.reshape(in_channel, ks * ks),                # [C, HW]
        "cw2": cw2.reshape(in_channel, ks * ks),                # [C, HW]
        "m1": _block_diagonal(mlp1, groups),                    # [C, mid]
        "m2": _block_diagonal(mlp2, groups),                    # [mid, C]
    }


# ----------------------------------------------------------------- reference

def ta2_reference(x_nchw, params):
    """Pure-JAX reference mirroring the PyTorch forward."""
    hi = jax.lax.Precision.HIGHEST
    b, c, h, w = x_nchw.shape
    x = x_nchw.reshape(b, c, h * w)
    w1 = jnp.einsum("bcs,cs->bc", x, params["cw1"], precision=hi)
    w2 = jnp.einsum("bcs,cs->bc", x, params["cw2"], precision=hi)
    y1 = jnp.dot(jnp.maximum(jnp.dot(w1, params["m1"], precision=hi), 0.0),
                 params["m2"], precision=hi)
    y2 = jnp.dot(jnp.maximum(jnp.dot(w2, params["m1"], precision=hi), 0.0),
                 params["m2"], precision=hi)
    weight = jax.nn.sigmoid(y1 + y2)
    return (weight[:, :, None] * x).reshape(b, c, h, w)


# ----------------------------------------------------------------- main

if __name__ == "__main__":
    # TA2(in_channel=18, groups=3, ks=16, ratio=9) on x: [2, 18, 16, 16].
    # ks == spatial size so the depthwise conv output is 1x1 and the final
    # `weight * x` broadcast matches the PyTorch module's semantics.
    B, C, HW_SIZE, GROUPS, KS, RATIO = 2, 18, 16, 3, 16, 9

    key = jax.random.PRNGKey(0)
    kx, kp = jax.random.split(key)
    x = jax.random.normal(kx, (B, C, HW_SIZE, HW_SIZE), jnp.float32)
    params = init_ta2(kp, C, GROUPS, KS, RATIO)

    fwd = jax.jit(ta2_forward)
    y = jax.block_until_ready(fwd(x, params))

    assert y.shape == (B, C, HW_SIZE, HW_SIZE), y.shape
    assert bool(jnp.all(jnp.isfinite(y)))

    y_ref = ta2_reference(x, params)
    assert bool(jnp.allclose(y, y_ref, rtol=1e-2, atol=1e-2))
    print("KERNEL_OK")
</pallas_src>

<mosaic_0001>
module attributes {stable_mosaic.version = 11 : i64} {
  func.func @_ta2_kernel(%arg0: memref<2x18x256xf32, #tpu.memory_space<vmem>>, %arg1: memref<18x256xf32, #tpu.memory_space<vmem>>, %arg2: memref<18x256xf32, #tpu.memory_space<vmem>>, %arg3: memref<18x6xf32, #tpu.memory_space<vmem>>, %arg4: memref<6x18xf32, #tpu.memory_space<vmem>>, %arg5: memref<2x18x256xf32, #tpu.memory_space<vmem>>) attributes {dimension_semantics = [], scalar_prefetch = 0 : i64, scratch_operands = 0 : i64, tpu.core_type = #tpu.core_type<tc>} {
    %c0 = arith.constant 0 : index
    %c0_0 = arith.constant 0 : index
    %c0_1 = arith.constant 0 : index
    %0 = vector.load %arg0[%c0, %c0_0, %c0_1] : memref<2x18x256xf32, #tpu.memory_space<vmem>>, vector<2x18x256xf32>
    %c0_2 = arith.constant 0 : index
    %c0_3 = arith.constant 0 : index
    %1 = vector.load %arg1[%c0_2, %c0_3] : memref<18x256xf32, #tpu.memory_space<vmem>>, vector<18x256xf32>
    %2 = vector.shape_cast %1 : vector<18x256xf32> to vector<1x18x256xf32>
    %3 = vector.broadcast %2 : vector<1x18x256xf32> to vector<2x18x256xf32>
    %4 = arith.mulf %0, %3 : vector<2x18x256xf32>
    %cst = arith.constant dense<0.000000e+00> : vector<2x18xf32>
    %5 = vector.multi_reduction <add>, %4, %cst [2] : vector<2x18x256xf32> to vector<2x18xf32>
    %c0_4 = arith.constant 0 : index
    %c0_5 = arith.constant 0 : index
    %6 = vector.load %arg2[%c0_4, %c0_5] : memref<18x256xf32, #tpu.memory_space<vmem>>, vector<18x256xf32>
    %7 = vector.shape_cast %6 : vector<18x256xf32> to vector<1x18x256xf32>
    %8 = vector.broadcast %7 : vector<1x18x256xf32> to vector<2x18x256xf32>
    %9 = arith.mulf %0, %8 : vector<2x18x256xf32>
    %cst_6 = arith.constant dense<0.000000e+00> : vector<2x18xf32>
    %10 = vector.multi_reduction <add>, %9, %cst_6 [2] : vector<2x18x256xf32> to vector<2x18xf32>
    %c0_7 = arith.constant 0 : index
    %c0_8 = arith.constant 0 : index
    %11 = vector.load %arg3[%c0_7, %c0_8] : memref<18x6xf32, #tpu.memory_space<vmem>>, vector<18x6xf32>
    %c0_9 = arith.constant 0 : index
    %c0_10 = arith.constant 0 : index
    %12 = vector.load %arg4[%c0_9, %c0_10] : memref<6x18xf32, #tpu.memory_space<vmem>>, vector<6x18xf32>
    %cst_11 = arith.constant dense<0.000000e+00> : vector<2x6xf32>
    %13 = tpu.matmul %5, %11, %cst_11 {dimension_numbers = #tpu.dot_dimension_numbers<[1], [0], [0], [1], [0, 0, 1, 1], [], []>} : vector<2x18xf32>, vector<18x6xf32>, vector<2x6xf32> -> vector<2x6xf32>
    %cst_12 = arith.constant 0.000000e+00 : f32
    %14 = vector.broadcast %cst_12 : f32 to vector<2x6xf32>
    %15 = arith.maximumf %13, %14 : vector<2x6xf32>
    %cst_13 = arith.constant dense<0.000000e+00> : vector<2x6xf32>
    %16 = tpu.matmul %10, %11, %cst_13 {dimension_numbers = #tpu.dot_dimension_numbers<[1], [0], [0], [1], [0, 0, 1, 1], [], []>} : vector<2x18xf32>, vector<18x6xf32>, vector<2x6xf32> -> vector<2x6xf32>
    %cst_14 = arith.constant 0.000000e+00 : f32
    %17 = vector.broadcast %cst_14 : f32 to vector<2x6xf32>
    %18 = arith.maximumf %16, %17 : vector<2x6xf32>
    %cst_15 = arith.constant dense<0.000000e+00> : vector<2x18xf32>
    %19 = tpu.matmul %15, %12, %cst_15 {dimension_numbers = #tpu.dot_dimension_numbers<[1], [0], [0], [1], [0, 0, 1, 1], [], []>} : vector<2x6xf32>, vector<6x18xf32>, vector<2x18xf32> -> vector<2x18xf32>
    %cst_16 = arith.constant dense<0.000000e+00> : vector<2x18xf32>
    %20 = tpu.matmul %18, %12, %cst_16 {dimension_numbers = #tpu.dot_dimension_numbers<[1], [0], [0], [1], [0, 0, 1, 1], [], []>} : vector<2x6xf32>, vector<6x18xf32>, vector<2x18xf32> -> vector<2x18xf32>
    %21 = arith.addf %19, %20 : vector<2x18xf32>
    %22 = arith.negf %21 : vector<2x18xf32>
    %23 = math.exp %22 : vector<2x18xf32>
    %cst_17 = arith.constant 1.000000e+00 : f32
    %24 = vector.broadcast %cst_17 : f32 to vector<2x18xf32>
    %25 = arith.addf %24, %23 : vector<2x18xf32>
    %26 = arith.divf %24, %25 : vector<2x18xf32>
    %27 = vector.shape_cast %26 : vector<2x18xf32> to vector<2x18x1xf32>
    %28 = vector.broadcast %27 : vector<2x18x1xf32> to vector<2x18x256xf32>
    %29 = arith.mulf %28, %0 : vector<2x18x256xf32>
    %c0_18 = arith.constant 0 : index
    %c0_19 = arith.constant 0 : index
    %c0_20 = arith.constant 0 : index
    %30 = vector.load %arg5[%c0_18, %c0_19, %c0_20] : memref<2x18x256xf32, #tpu.memory_space<vmem>>, vector<2x18x256xf32>
    tpu.vector_store %arg5[%c0_18, %c0_19, %c0_20], %29 {strides = array<i32>} : memref<2x18x256xf32, #tpu.memory_space<vmem>>, vector<2x18x256xf32>,
    return
  }
}

</mosaic_0001>

<bundles_post_ra>
// kernel: ta2_forward.1
= control target key start
LH: loop header
LB: loop body
LE: loop exit
PB: predicated region body
PF: predicated region fallthrough
CT: control target
= control target key end

     0   :  { %vm56_vm0 = vcmask 1041408   ;;  %vm128_vm1 = vcmask 130112   ;;  %vm132_vm2 = vcmask 195712   ;;  %vm139_vm3 = vcmask 1041409   ;;  %s587_s0 = inlined_call_operand.vmem [shape: f32[2,18,256], index: 0, kind: input, shape index: {}]   ;;  %s588_s1 = inlined_call_operand.vmem [shape: f32[18,256], index: 1, kind: input, shape index: {}]   ;;  %s589_s2 = inlined_call_operand.vmem [shape: f32[18,256], index: 2, kind: input, shape index: {}]   ;;  %s590_s3 = inlined_call_operand.vmem [shape: f32[18,6], index: 3, kind: input, shape index: {}]   ;;  %s591_s4 = inlined_call_operand.vmem [shape: f32[6,18], index: 4, kind: input, shape index: {}]   ;;  %s592_s5 = inlined_call_operand.vmem [shape: f32[2,18,256], index: 5, kind: output, shape index: {}]  }
   0x1   :  { %v396_v0 = vld [vmem:[%s587_s0 + $0x30] sm:$0xff]  ;;  %v401_v1 = vld [vmem:[%s587_s0 + $0x38] sm:$0xff]  ;;  %v32_v2 = vld [vmem:[%s588_s1] sm:$0xff]  ;;  %vm141_vm4 = vcmask 146432   ;;  %vm212_vm5 = vcmask 1045504   ;;  %vm208_vm6 = vcmask 48128  }
   0x2   :  { %v33_v3 = vld [vmem:[%s588_s1 + $0x8] sm:$0xff]  ;;  %v44_v4 = vmul.f32 %v32_v2, %v396_v0  ;;  %v413_v5 = vld [vmem:[%s587_s0] sm:$0xff]  ;;  %v34_v16 = vld [vmem:[%s588_s1 + $0x10] sm:$0xff] }
   0x3   :  { %v418_v6 = vld [vmem:[%s587_s0 + $0x8] sm:$0xff]  ;;  %v45_v7 = vmul.f32 %v33_v3, %v401_v1  ;;  %v73_v8 = vld [vmem:[%s589_s2] sm:$0xff]  ;;  %v38_v10 = vmul.f32 %v32_v2, %v413_v5  ;;  %v35_v17 = vld [vmem:[%s588_s1 + $0x18] sm:$0xff] }
   0x4   :  { %v74_v9 = vld [vmem:[%s589_s2 + $0x8] sm:$0xff]  ;;  %v39_v11 = vmul.f32 %v33_v3, %v418_v6  ;;  %v432_v12 = vld [vmem:[%s587_s0 + $0x40] sm:$0xff]  ;;  %v79_v13 = vmul.f32 %v73_v8, %v413_v5  ;;  %v450_v20 = vld [vmem:[%s587_s0 + $0x10] sm:$0xff]  ;;  %v85_v40 = vmul.f32 %v73_v8, %v396_v0 }
   0x5   :  { %v80_v14 = vmul.f32 %v74_v9, %v418_v6  ;;  %v439_v15 = vld [vmem:[%s587_s0 + $0x48] sm:$0xff]  ;;  %v62_v18 = vadd.f32 %v45_v7, %v44_v4  ;;  %v455_v21 = vld [vmem:[%s587_s0 + $0x18] sm:$0xff]  ;;  %v75_v22 = vld [vmem:[%s589_s2 + $0x10] sm:$0xff]  ;;  %v46_v24 = vmul.f32 %v34_v16, %v432_v12  ;;  %v40_v27 = vmul.f32 %v34_v16, %v450_v20 }
   0x6   :  { %v50_v19 = vadd.f32 %v39_v11, %v38_v10  ;;  %v76_v25 = vld [vmem:[%s589_s2 + $0x18] sm:$0xff]  ;;  %v47_v26 = vmul.f32 %v35_v17, %v439_v15  ;;  %v41_v28 = vmul.f32 %v35_v17, %v455_v21  ;;  %v81_v29 = vmul.f32 %v75_v22, %v450_v20  ;;  %v472_v31 = vld [vmem:[%s587_s0 + $0x20] sm:$0x3]  ;;  %v477_v32 = vld [vmem:[%s587_s0 + $0x28] sm:$0x3] }
   0x7   :  { %v91_v23 = vadd.f32 %v80_v14, %v79_v13  ;;  %63 = vadd.xlane.f32.xlu1 %v62_v18  ;;  %v82_v30 = vmul.f32 %v76_v25, %v455_v21  ;;  %v36_v33 = vld [vmem:[%s588_s1 + $0x20] sm:$0x3]  ;;  %v37_v34 = vld [vmem:[%s588_s1 + $0x28] sm:$0x3]  ;;  %v87_v41 = vmul.f32 %v75_v22, %v432_v12  ;;  %v88_v42 = vmul.f32 %v76_v25, %v439_v15  ;;  %v502_v48 = vld [vmem:[%s587_s0 + $0x50] sm:$0x3] }
   0x8   :  { %51 = vadd.xlane.f32.xlu0 %v50_v19  ;;  %v65_v35 = vadd.f32 %v47_v26, %v46_v24  ;;  %v53_v36 = vadd.f32 %v41_v28, %v40_v27  ;;  %v42_v38 = vmul.f32 %v36_v33, %v472_v31  ;;  %v43_v39 = vmul.f32 %v37_v34, %v477_v32  ;;  %v77_v44 = vld [vmem:[%s589_s2 + $0x20] sm:$0x3]  ;;  %v78_v45 = vld [vmem:[%s589_s2 + $0x28] sm:$0x3]  ;;  %v507_v49 = vld [vmem:[%s587_s0 + $0x58] sm:$0x3] }
   0x9   :  { %92 = vadd.xlane.f32.xlu2 %v91_v23  ;;  %v94_v37 = vadd.f32 %v82_v30, %v81_v29  ;;  %v86_v43 = vmul.f32 %v74_v9, %v401_v1  ;;  %v105_v50 = vadd.f32 %v88_v42, %v87_v41  ;;  %v83_v52 = vmul.f32 %v77_v44, %v472_v31  ;;  %v115_v8 = vld [vmem:[%s590_s3 + $0x10] sm:$0x3]  ;;  %v114_v9 = vld [vmem:[%s590_s3 + $0x8] sm:$0xff]  ;;  %v113_v10 = vld [vmem:[%s590_s3] sm:$0xff] }
   0xa   :  { %v57_v46 = vsel %vm56_vm0, %v42_v38, 0.0  ;;  %v58_v47 = vsel %vm56_vm0, %v43_v39, 0.0  ;;  %v84_v54 = vmul.f32 %v78_v45, %v477_v32  ;;  %v48_v55 = vmul.f32 %v36_v33, %v502_v48  ;;  %344 = vmatpush.msk.msra.mxu0 %vm56_vm0, %v115_v8  ;;  %346 = vmatpush.msk.msra.mxu1 %vm56_vm0, %v115_v8 }
   0xb   :  { %v102_v51 = vadd.f32 %v86_v43, %v85_v40  ;;  %v59_v53 = vadd.f32 %v58_v47, %v57_v46  ;;  %v49_v56 = vmul.f32 %v37_v34, %v507_v49  ;;  %v89_v57 = vmul.f32 %v77_v44, %v502_v48 }
   0xc   :  { %v90_v58 = vmul.f32 %v78_v45, %v507_v49  ;;  %v97_v59 = vsel %vm56_vm0, %v83_v52, 0.0  ;;  %v98_v60 = vsel %vm56_vm0, %v84_v54, 0.0  ;;  %v68_v61 = vsel %vm56_vm0, %v48_v55, 0.0  ;;  %161 = vmatpush.msra.mxu0 %v114_v9  ;;  %201 = vmatpush.msra.mxu1 %v114_v9 }
   0xd   :  { %v69_v62 = vsel %vm56_vm0, %v49_v56, 0.0  ;;  %v108_v63 = vsel %vm56_vm0, %v89_v57, 0.0  ;;  %v99_v3 = vadd.f32 %v98_v60, %v97_v59  ;;  %v123_v19 = vlaneseq  ;;  %v116_v57 = vld [vmem:[%s591_s4] sm:$0x3f] }
   0xe   :  { %v109_v2 = vsel %vm56_vm0, %v90_v58, 0.0  ;;  %v70_v4 = vadd.f32 %v69_v62, %v68_v61  ;;  %162 = vmatpush.msra.mxu0 %v113_v10  ;;  %202 = vmatpush.msra.mxu1 %v113_v10 }
   0xf   :  { %66 = vadd.xlane.f32.xlu1 %v65_v35  ;;  %v110_v7 = vadd.f32 %v109_v2, %v108_v63  ;;  %v124_v22 = vand.u32 127, %v123_v19  ;;  %348 = vmatpush.msk.msra.mxu2 %vm212_vm5, %v116_v57  ;;  %v280_v62 = vshrl.u32 %v123_v19, 7 }
  0x10   :  { %54 = vadd.xlane.f32.xlu0 %v53_v36  ;;  %350 = vmatpush.msk.msra.mxu3 %vm212_vm5, %v116_v57 }
  0x11   :  { %95 = vadd.xlane.f32.xlu2 %v94_v37  ;;  %v126_v26 = vadd.s32 4294967288, %v124_v22  ;;  %v130_v27 = vadd.s32 4294967280, %v124_v22  ;;  %353 = vset.pattern.permute.xlu0 %v280_v62  ;;  %v293_v63 = vadd.s32 16, %v280_v62  ;;  %v287_v2 = vadd.s32 8, %v280_v62 }
  0x13   :  { %355 = vset.pattern.permute.xlu2 %v293_v63  ;;  %354 = vset.pattern.permute.xlu1 %v287_v2 }
  0x17   :  { %106 = vadd.xlane.f32.xlu1 %v105_v50 }
  0x18   :  { %103 = vadd.xlane.f32.xlu0 %v102_v51 }
  0x19   :  { %60 = vadd.xlane.f32.xlu2 %v59_v53 }
  0x1f   :  { %100 = vadd.xlane.f32.xlu1 %v99_v3 }
  0x20   :  { %71 = vadd.xlane.f32.xlu0 %v70_v4 }
  0x21   :  { %111 = vadd.xlane.f32.xlu2 %v110_v7 }
  0x7a   :  { %v64_v11 = vpop.xlane.xlu1 %63 }
  0x7b   :  { %v52_v13 = vpop.xlane.xlu0 %51  ;;  %v134_v36 = vperm.slane %v64_v11, %v124_v22 }
  0x7c   :  { %v93_v14 = vpop.xlane.xlu2 %92  ;;  %v125_v38 = vperm.slane %v52_v13, %v124_v22 }
  0x7d   :  { %v174_v37 = vperm.slane %v93_v14, %v124_v22 }
  0x82   :  { %v67_v16 = vpop.xlane.xlu1 %66 }
  0x83   :  { %v55_v17 = vpop.xlane.xlu0 %54  ;;  %v135_v28 = vperm.slane %v67_v16, %v126_v26 }
  0x84   :  { %v96_v18 = vpop.xlane.xlu2 %95  ;;  %v127_v30 = vperm.slane %v55_v17, %v126_v26 }
  0x85   :  { %v175_v29 = vperm.slane %v96_v18, %v126_v26  ;;  %v136_v44 = vsel %vm128_vm1, %v135_v28, %v134_v36 }
  0x86   :  { %v129_v46 = vsel %vm128_vm1, %v127_v30, %v125_v38 }
  0x87   :  { %v176_v45 = vsel %vm128_vm1, %v175_v29, %v174_v37 }
  0x8a   :  { %v107_v23 = vpop.xlane.xlu1 %106 }
  0x8b   :  { %v104_v24 = vpop.xlane.xlu0 %103  ;;  %v180_v33 = vperm.slane %v107_v23, %v126_v26 }
  0x8c   :  { %v61_v25 = vpop.xlane.xlu2 %60  ;;  %v179_v35 = vperm.slane %v104_v24, %v124_v22 }
  0x8d   :  { %v131_v34 = vperm.slane %v61_v25, %v130_v27 }
  0x8e   :  { %v181_v50 = vsel %vm128_vm1, %v180_v33, %v179_v35 }
  0x8f   :  { %v133_v51 = vsel %vm132_vm2, %v131_v34, %v129_v46 }
  0x92   :  { %v101_v39 = vpop.xlane.xlu1 %100 }
  0x93   :  { %v72_v40 = vpop.xlane.xlu0 %71  ;;  %v177_v41 = vperm.slane %v101_v39, %v130_v27 }
  0x94   :  { %v112_v42 = vpop.xlane.xlu2 %111  ;;  %v137_v43 = vperm.slane %v72_v40, %v130_v27 }
  0x95   :  { %v182_v47 = vperm.slane %v112_v42, %v130_v27  ;;  %v178_v53 = vsel %vm132_vm2, %v177_v41, %v176_v45 }
  0x96   :  { %v138_v52 = vsel %vm132_vm2, %v137_v43, %v136_v44 }
  0x97   :  { %v140_v54 = vsel %vm139_vm3, %v138_v52, %v133_v51  ;;  %v183_v55 = vsel %vm132_vm2, %v182_v47, %v181_v50 }
  0x98   :  { %345 = vmatmul.msk.f32.vlgmr.msra.gmra.mxu0 %vm141_vm4, %v140_v54  ;;  %v184_v56 = vsel %vm139_vm3, %v183_v55, %v178_v53 }
  0x99   :  { %347 = vmatmul.msk.f32.vlgmr.msra.gmra.mxu1 %vm141_vm4, %v184_v56 }
 0x115   :  { %v164_v58 = vpop.f32.mrf.mxu0 }
 0x116   :  { %v167_v59 = vmax.f32 %v164_v58, 0.0  ;;  %v204_v60 = vpop.f32.mrf.mxu1 }
 0x117   :  { %v207_v61 = vmax.f32 %v204_v60, 0.0 }
 0x118   :  { %351 = vmatmul.msk.f32.vlgmr.msra.gmra.mxu3 %vm208_vm6, %v167_v59 }
 0x119   :  { %349 = vmatmul.msk.f32.vlgmr.msra.gmra.mxu2 %vm208_vm6, %v207_v61 }
 0x19b   :  { %v256_v3 = vpop.f32.mrf.mxu3 }
 0x19c   :  { %v233_v4 = vpop.f32.mrf.mxu2 }
 0x19d   :  { %v257_v7 = vadd.f32 %v256_v3, %v233_v4 }
 0x19f   :  { %v352_v8 = vmul.f32 -1.442695, %v257_v7 }
 0x1a1   :  { %359 = vpow2.f32 %v352_v8 }
 0x1a7   :  { %v360_v9 = vpop.eup %359 }
 0x1a8   :  { %v262_v10 = vadd.f32 1.0, %v360_v9 }
 0x1aa   :  { %361 = vrcp.f32 %v262_v10  ;;  %v274_v16 = vand.u32 2147483648, %v262_v10  ;;  %v272_v18 = vand.u32 2147483647, %v262_v10  ;;  %vm268_vm8 = vweird.f32 %v262_v10 }
 0x1ac   :  { %v275_v22 = vor.u32 1.1754944e-38, %v274_v16  ;;  %vm273_vm10 = vcmp.eq.f32.partialorder %v272_v18, 8.507059e+37 }
 0x1b0   :  { %v362_v11 = vpop.eup %361 }
 0x1b1   :  { %v264_v13 = vmul.f32 %v362_v11, %v262_v10  ;;  %vm269_vm7 = vweird.f32 %v362_v11 }
 0x1b2   :  { %vm270_vm9 = vmor %vm268_vm8, %vm269_vm7 }
 0x1b3   :  { %v265_v14 = vsub.f32 1.0, %v264_v13 }
 0x1b5   :  { %v266_v17 = vmul.f32 %v362_v11, %v265_v14 }
 0x1b7   :  { %v267_v19 = vadd.f32 %v362_v11, %v266_v17 }
 0x1b9   :  { %v271_v23 = vsel %vm270_vm9, %v362_v11, %v267_v19 }
 0x1ba   :  { %v276_v24 = vsel %vm273_vm10, %v275_v22, %v271_v23 }
 0x1bb   :  { %v278_v25 = vperm.slane %v276_v24, 0  ;;  %v297_v26 = vperm.slane %v276_v24, 1 }
 0x1bd   :  { %295 = vperm.xlu2 %355, %v278_v25   ;;  %289 = vperm.xlu1 %354, %v278_v25  }
 0x1be   :  { %283 = vperm.xlu0 %353, %v278_v25  }
 0x1c5   :  { %356 = vset.pattern.permute.xlu2 %v280_v62  ;;  %308 = vperm.xlu1 %354, %v297_v26  }
 0x1c6   :  { %358 = vset.pattern.permute.xlu0 %v293_v63 }
 0x1cd   :  { %302 = vperm.xlu2 %356, %v297_v26  }
 0x1d5   :  { %357 = vset.pattern.permute.xlu2 %v293_v63 }
 0x1dd   :  { %314 = vperm.xlu2 %357, %v297_v26  }
 0x217   :  { %v296_v27 = vpop.permute.xlu2 %295 }
 0x218   :  { %v320_v28 = vmul.f32 %v296_v27, %v472_v31  ;;  %v321_v29 = vmul.f32 %v296_v27, %v477_v32 }
 0x21a   :  { %332 = vst [vmem:[%s592_s5 + $0x20] sm:$0x3] %v320_v28 }
 0x21b   :  { %333 = vst [vmem:[%s592_s5 + $0x28] sm:$0x3] %v321_v29 }
 0x227   :  { %v303_v30 = vpop.permute.xlu2 %302 }
 0x228   :  { %v322_v33 = vmul.f32 %v303_v30, %v396_v0  ;;  %v323_v34 = vmul.f32 %v303_v30, %v401_v1 }
 0x22a   :  { %334 = vst [vmem:[%s592_s5 + $0x30] sm:$0xff] %v322_v33 }
 0x22b   :  { %335 = vst [vmem:[%s592_s5 + $0x38] sm:$0xff] %v323_v34 }
 0x22f   :  { %v290_v31 = vpop.permute.xlu1 %289 }
 0x230   :  { %v318_v32 = vmul.f32 %v290_v31, %v450_v20  ;;  %v319_v35 = vmul.f32 %v290_v31, %v455_v21  ;;  %v284_v36 = vpop.permute.xlu0 %283 }
 0x231   :  { %v316_v37 = vmul.f32 %v284_v36, %v413_v5  ;;  %v317_v0 = vmul.f32 %v284_v36, %v418_v6 }
 0x232   :  { %330 = vst [vmem:[%s592_s5 + $0x10] sm:$0xff] %v318_v32 }
 0x233   :  { %331 = vst [vmem:[%s592_s5 + $0x18] sm:$0xff] %v319_v35 }
 0x234   :  { %328 = vst [vmem:[%s592_s5] sm:$0xff] %v316_v37 }
 0x235   :  { %329 = vst [vmem:[%s592_s5 + $0x8] sm:$0xff] %v317_v0 }
 0x237   :  { %v315_v1 = vpop.permute.xlu2 %314  ;;  %v309_v5 = vpop.permute.xlu1 %308 }
 0x238   :  { %v326_v6 = vmul.f32 %v315_v1, %v502_v48  ;;  %v327_v20 = vmul.f32 %v315_v1, %v507_v49  ;;  %v324_v21 = vmul.f32 %v309_v5, %v432_v12  ;;  %v325_v38 = vmul.f32 %v309_v5, %v439_v15 }
 0x23a   :  { %338 = vst [vmem:[%s592_s5 + $0x50] sm:$0x3] %v326_v6 }
 0x23b   :  { %339 = vst [vmem:[%s592_s5 + $0x58] sm:$0x3] %v327_v20 }
 0x23c   :  { %336 = vst [vmem:[%s592_s5 + $0x40] sm:$0xff] %v324_v21 }
 0x23d   :  { %337 = vst [vmem:[%s592_s5 + $0x48] sm:$0xff] %v325_v38 }

</bundles_post_ra>
